<compile_context>
chip_gen: v5e
topology: v5e:2x2
jax: 0.10.0
libtpu: 0.0.40
codegen_flags: <defaults>
</compile_context>

<pallas_src>
import functools

import jax
import jax.numpy as jnp
from jax.experimental import pallas as pl
from jax.experimental.pallas import tpu as pltpu


def _round_up(a, b):
    return (a + b - 1) // b * b


def _outconv_kernel(w_ref, b_ref, x_ref, o_ref):
    # w_ref: SMEM (Cout, Cin) f32 scalars
    # b_ref: SMEM (Cout,)     f32 scalars
    # x_ref: VMEM (1, Cin,  tr, 128)  — dense rows x lanes spatial tile
    # o_ref: VMEM (1, Cout, tr, 128)
    cout, cin = w_ref.shape
    for co in range(cout):
        # out[co] = sum_ci w[co,ci] * x[ci] + b[co]   (pure VPU FMAs)
        y = x_ref[0, 0].astype(jnp.float32) * w_ref[co, 0]
        for ci in range(1, cin):
            y = y + x_ref[0, ci].astype(jnp.float32) * w_ref[co, ci]
        # Direct per-channel store: no sublane stack / relayout.
        o_ref[0, co] = (y + b_ref[co]).astype(o_ref.dtype)


@functools.partial(jax.jit, static_argnames=("ts",))
def outconv(x, weight, bias, *, ts=262144):
    """1x1x1 Conv3d (PyTorch OutConv forward).

    x:      (N, Cin, D, H, W)
    weight: (Cout, Cin, 1, 1, 1)  (PyTorch Conv3d weight layout)
    bias:   (Cout,)
    returns (N, Cout, D, H, W)
    """
    n, cin, d, h, w = x.shape
    cout, cin_w, kd, kh, kw = weight.shape
    # Explicit kernel_size == 1 contract (static shapes -> trace-time check).
    assert (kd, kh, kw) == (1, 1, 1) and cin_w == cin, "OutConv expects 1x1x1 kernel"

    s = d * h * w
    s_pad = _round_up(s, 128)

    # Free reshape; pad S to a lane multiple only if ragged (one-time pass).
    x3 = x.reshape(n, cin, s)
    if s_pad != s:
        x3 = jnp.pad(x3, ((0, 0), (0, 0), (0, s_pad - s)))
    rows = s_pad // 128
    x4 = x3.reshape(n, cin, rows, 128)                 # dense rows x 128 lanes

    w_mat = weight.reshape(cout, cin).astype(jnp.float32)   # -> SMEM
    b_vec = bias.reshape(cout).astype(jnp.float32)           # -> SMEM

    # --- spatial tile selection (in 128-lane rows) ------------------------
    itemsize = jnp.dtype(x.dtype).itemsize
    # Keep double-buffered in+out tiles under ~24 MiB (fits v7x 64 MiB VMEM /
    # 32 MiB scoped limit with headroom; v5e/v6e have more).
    vmem_budget = 24 * 1024 * 1024
    tr_cap = vmem_budget // (2 * (cin + cout) * 128 * max(itemsize, 4))
    tr_cap = max(8, (tr_cap // 8) * 8)

    tr = (max(ts, 1024) // 128 // 8) * 8               # sublane-aligned rows
    tr = max(8, min(tr, tr_cap))
    if tr >= rows:
        if n == 1 and rows >= 16:
            # v7x has 2 TensorCores: make sure there are >= 2 grid points.
            tr = _round_up(pl.cdiv(rows, 2), 8)
        else:
            tr = rows                                   # full-extent block OK
    num_tiles = pl.cdiv(rows, tr)
    grid = (n, num_tiles)

    cost = pl.CostEstimate(
        flops=2 * cin * cout * n * s,
        transcendentals=0,
        bytes_accessed=(cin + cout) * n * s_pad * itemsize,
    )

    out4 = pl.pallas_call(
        _outconv_kernel,
        out_shape=jax.ShapeDtypeStruct((n, cout, rows, 128), x.dtype),
        grid_spec=pltpu.PrefetchScalarGridSpec(
            num_scalar_prefetch=0,
            grid=grid,
            in_specs=[
                # weights + bias: whole arrays in SMEM, read as scalars.
                pl.BlockSpec(memory_space=pltpu.MemorySpace.SMEM),
                pl.BlockSpec(memory_space=pltpu.MemorySpace.SMEM),
                # activations: (1, Cin, tr, 128) dense blocks.
                pl.BlockSpec((1, cin, tr, 128), lambda b, si: (b, 0, si, 0)),
            ],
            out_specs=pl.BlockSpec((1, cout, tr, 128), lambda b, si: (b, 0, si, 0)),
        ),
        compiler_params=pltpu.CompilerParams(
            dimension_semantics=("parallel", "parallel"),
            vmem_limit_bytes=32 * 1024 * 1024,
        ),
        cost_estimate=cost,
    )(w_mat, b_vec, x4)

    out3 = out4.reshape(n, cout, s_pad)
    if s_pad != s:
        out3 = out3[:, :, :s]
    return out3.reshape(n, cout, d, h, w)              # free reshape to NCDHW


if __name__ == "__main__":
    key = jax.random.PRNGKey(0)
    kx, kw, kb, kx2 = jax.random.split(key, 4)

    # Shapes consistent with OutConv(in_channels=4, out_channels=3).
    N, Cin, Cout, D, H, W = 2, 4, 3, 4, 8, 8
    x = jax.random.normal(kx, (N, Cin, D, H, W), dtype=jnp.float32)
    weight = jax.random.normal(kw, (Cout, Cin, 1, 1, 1), dtype=jnp.float32) * 0.1
    bias = jax.random.normal(kb, (Cout,), dtype=jnp.float32) * 0.1

    out = jax.block_until_ready(outconv(x, weight, bias))
    ref = jnp.einsum("ncdhw,oc->nodhw", x, weight.reshape(Cout, Cin)) \
        + bias.reshape(1, Cout, 1, 1, 1)
    assert out.shape == (N, Cout, D, H, W)
    assert jnp.allclose(out, ref, atol=1e-5, rtol=1e-5)

    # Ragged spatial size (exercises the pad-to-128 + slice-back path).
    D2, H2, W2 = 3, 5, 7
    x2 = jax.random.normal(kx2, (1, Cin, D2, H2, W2), dtype=jnp.float32)
    out2 = jax.block_until_ready(outconv(x2, weight, bias))
    ref2 = jnp.einsum("ncdhw,oc->nodhw", x2, weight.reshape(Cout, Cin)) \
        + bias.reshape(1, Cout, 1, 1, 1)
    assert out2.shape == (1, Cout, D2, H2, W2)
    assert jnp.allclose(out2, ref2, atol=1e-5, rtol=1e-5)

    print("KERNEL_OK")
</pallas_src>

<mosaic_0001>
module attributes {stable_mosaic.version = 11 : i64} {
  func.func @_outconv_kernel(%arg0: i32, %arg1: i32, %arg2: memref<3x4xf32, #tpu.memory_space<smem>>, %arg3: memref<3xf32, #tpu.memory_space<smem>>, %arg4: memref<1x4x2x128xf32, #tpu.memory_space<vmem>>, %arg5: memref<1x3x2x128xf32, #tpu.memory_space<vmem>>) attributes {dimension_semantics = [#tpu.dimension_semantics<parallel>, #tpu.dimension_semantics<parallel>], iteration_bounds = array<i64: 2, 1>, scalar_prefetch = 0 : i64, scratch_operands = 0 : i64, tpu.core_type = #tpu.core_type<tc>, window_params = [{transform_indices = @transform_0, window_bounds = array<i64: 3, 4>}, {transform_indices = @transform_1, window_bounds = array<i64: 3>}, {transform_indices = @transform_2, window_bounds = array<i64: 1, 4, 2, 128>}, {transform_indices = @transform_3, window_bounds = array<i64: 1, 3, 2, 128>}]} {
    %c0 = arith.constant 0 : index
    %c0_0 = arith.constant 0 : index
    %c0_1 = arith.constant 0 : index
    %c0_2 = arith.constant 0 : index
    %0 = vector.load %arg4[%c0, %c0_0, %c0_1, %c0_2] : memref<1x4x2x128xf32, #tpu.memory_space<vmem>>, vector<1x1x2x128xf32>
    %1 = vector.shape_cast %0 : vector<1x1x2x128xf32> to vector<2x128xf32>
    %c0_3 = arith.constant 0 : index
    %c0_4 = arith.constant 0 : index
    %2 = memref.load %arg2[%c0_3, %c0_4] : memref<3x4xf32, #tpu.memory_space<smem>>
    %3 = vector.broadcast %2 : f32 to vector<2x128xf32>
    %4 = arith.mulf %1, %3 : vector<2x128xf32>
    %c0_5 = arith.constant 0 : index
    %c1 = arith.constant 1 : index
    %c0_6 = arith.constant 0 : index
    %c0_7 = arith.constant 0 : index
    %5 = vector.load %arg4[%c0_5, %c1, %c0_6, %c0_7] : memref<1x4x2x128xf32, #tpu.memory_space<vmem>>, vector<1x1x2x128xf32>
    %6 = vector.shape_cast %5 : vector<1x1x2x128xf32> to vector<2x128xf32>
    %c0_8 = arith.constant 0 : index
    %c1_9 = arith.constant 1 : index
    %7 = memref.load %arg2[%c0_8, %c1_9] : memref<3x4xf32, #tpu.memory_space<smem>>
    %8 = vector.broadcast %7 : f32 to vector<2x128xf32>
    %9 = arith.mulf %6, %8 : vector<2x128xf32>
    %10 = arith.addf %4, %9 : vector<2x128xf32>
    %c0_10 = arith.constant 0 : index
    %c2 = arith.constant 2 : index
    %c0_11 = arith.constant 0 : index
    %c0_12 = arith.constant 0 : index
    %11 = vector.load %arg4[%c0_10, %c2, %c0_11, %c0_12] : memref<1x4x2x128xf32, #tpu.memory_space<vmem>>, vector<1x1x2x128xf32>
    %12 = vector.shape_cast %11 : vector<1x1x2x128xf32> to vector<2x128xf32>
    %c0_13 = arith.constant 0 : index
    %c2_14 = arith.constant 2 : index
    %13 = memref.load %arg2[%c0_13, %c2_14] : memref<3x4xf32, #tpu.memory_space<smem>>
    %14 = vector.broadcast %13 : f32 to vector<2x128xf32>
    %15 = arith.mulf %12, %14 : vector<2x128xf32>
    %16 = arith.addf %10, %15 : vector<2x128xf32>
    %c0_15 = arith.constant 0 : index
    %c3 = arith.constant 3 : index
    %c0_16 = arith.constant 0 : index
    %c0_17 = arith.constant 0 : index
    %17 = vector.load %arg4[%c0_15, %c3, %c0_16, %c0_17] : memref<1x4x2x128xf32, #tpu.memory_space<vmem>>, vector<1x1x2x128xf32>
    %18 = vector.shape_cast %17 : vector<1x1x2x128xf32> to vector<2x128xf32>
    %c0_18 = arith.constant 0 : index
    %c3_19 = arith.constant 3 : index
    %19 = memref.load %arg2[%c0_18, %c3_19] : memref<3x4xf32, #tpu.memory_space<smem>>
    %20 = vector.broadcast %19 : f32 to vector<2x128xf32>
    %21 = arith.mulf %18, %20 : vector<2x128xf32>
    %22 = arith.addf %16, %21 : vector<2x128xf32>
    %c0_20 = arith.constant 0 : index
    %23 = memref.load %arg3[%c0_20] : memref<3xf32, #tpu.memory_space<smem>>
    %24 = vector.broadcast %23 : f32 to vector<2x128xf32>
    %25 = arith.addf %22, %24 : vector<2x128xf32>
    %c0_21 = arith.constant 0 : index
    %c0_22 = arith.constant 0 : index
    %c0_23 = arith.constant 0 : index
    %c0_24 = arith.constant 0 : index
    %26 = vector.load %arg5[%c0_21, %c0_22, %c0_23, %c0_24] : memref<1x3x2x128xf32, #tpu.memory_space<vmem>>, vector<1x1x2x128xf32>
    %27 = vector.shape_cast %26 : vector<1x1x2x128xf32> to vector<2x128xf32>
    %28 = vector.shape_cast %25 : vector<2x128xf32> to vector<1x1x2x128xf32>
    tpu.vector_store %arg5[%c0_21, %c0_22, %c0_23, %c0_24], %28 {strides = array<i32>} : memref<1x3x2x128xf32, #tpu.memory_space<vmem>>, vector<1x1x2x128xf32>,
    %c0_25 = arith.constant 0 : index
    %c0_26 = arith.constant 0 : index
    %c0_27 = arith.constant 0 : index
    %c0_28 = arith.constant 0 : index
    %29 = vector.load %arg4[%c0_25, %c0_26, %c0_27, %c0_28] : memref<1x4x2x128xf32, #tpu.memory_space<vmem>>, vector<1x1x2x128xf32>
    %30 = vector.shape_cast %29 : vector<1x1x2x128xf32> to vector<2x128xf32>
    %c1_29 = arith.constant 1 : index
    %c0_30 = arith.constant 0 : index
    %31 = memref.load %arg2[%c1_29, %c0_30] : memref<3x4xf32, #tpu.memory_space<smem>>
    %32 = vector.broadcast %31 : f32 to vector<2x128xf32>
    %33 = arith.mulf %30, %32 : vector<2x128xf32>
    %c0_31 = arith.constant 0 : index
    %c1_32 = arith.constant 1 : index
    %c0_33 = arith.constant 0 : index
    %c0_34 = arith.constant 0 : index
    %34 = vector.load %arg4[%c0_31, %c1_32, %c0_33, %c0_34] : memref<1x4x2x128xf32, #tpu.memory_space<vmem>>, vector<1x1x2x128xf32>
    %35 = vector.shape_cast %34 : vector<1x1x2x128xf32> to vector<2x128xf32>
    %c1_35 = arith.constant 1 : index
    %c1_36 = arith.constant 1 : index
    %36 = memref.load %arg2[%c1_35, %c1_36] : memref<3x4xf32, #tpu.memory_space<smem>>
    %37 = vector.broadcast %36 : f32 to vector<2x128xf32>
    %38 = arith.mulf %35, %37 : vector<2x128xf32>
    %39 = arith.addf %33, %38 : vector<2x128xf32>
    %c0_37 = arith.constant 0 : index
    %c2_38 = arith.constant 2 : index
    %c0_39 = arith.constant 0 : index
    %c0_40 = arith.constant 0 : index
    %40 = vector.load %arg4[%c0_37, %c2_38, %c0_39, %c0_40] : memref<1x4x2x128xf32, #tpu.memory_space<vmem>>, vector<1x1x2x128xf32>
    %41 = vector.shape_cast %40 : vector<1x1x2x128xf32> to vector<2x128xf32>
    %c1_41 = arith.constant 1 : index
    %c2_42 = arith.constant 2 : index
    %42 = memref.load %arg2[%c1_41, %c2_42] : memref<3x4xf32, #tpu.memory_space<smem>>
    %43 = vector.broadcast %42 : f32 to vector<2x128xf32>
    %44 = arith.mulf %41, %43 : vector<2x128xf32>
    %45 = arith.addf %39, %44 : vector<2x128xf32>
    %c0_43 = arith.constant 0 : index
    %c3_44 = arith.constant 3 : index
    %c0_45 = arith.constant 0 : index
    %c0_46 = arith.constant 0 : index
    %46 = vector.load %arg4[%c0_43, %c3_44, %c0_45, %c0_46] : memref<1x4x2x128xf32, #tpu.memory_space<vmem>>, vector<1x1x2x128xf32>
    %47 = vector.shape_cast %46 : vector<1x1x2x128xf32> to vector<2x128xf32>
    %c1_47 = arith.constant 1 : index
    %c3_48 = arith.constant 3 : index
    %48 = memref.load %arg2[%c1_47, %c3_48] : memref<3x4xf32, #tpu.memory_space<smem>>
    %49 = vector.broadcast %48 : f32 to vector<2x128xf32>
    %50 = arith.mulf %47, %49 : vector<2x128xf32>
    %51 = arith.addf %45, %50 : vector<2x128xf32>
    %c1_49 = arith.constant 1 : index
    %52 = memref.load %arg3[%c1_49] : memref<3xf32, #tpu.memory_space<smem>>
    %53 = vector.broadcast %52 : f32 to vector<2x128xf32>
    %54 = arith.addf %51, %53 : vector<2x128xf32>
    %c0_50 = arith.constant 0 : index
    %c1_51 = arith.constant 1 : index
    %c0_52 = arith.constant 0 : index
    %c0_53 = arith.constant 0 : index
    %55 = vector.load %arg5[%c0_50, %c1_51, %c0_52, %c0_53] : memref<1x3x2x128xf32, #tpu.memory_space<vmem>>, vector<1x1x2x128xf32>
    %56 = vector.shape_cast %55 : vector<1x1x2x128xf32> to vector<2x128xf32>
    %57 = vector.shape_cast %54 : vector<2x128xf32> to vector<1x1x2x128xf32>
    tpu.vector_store %arg5[%c0_50, %c1_51, %c0_52, %c0_53], %57 {strides = array<i32>} : memref<1x3x2x128xf32, #tpu.memory_space<vmem>>, vector<1x1x2x128xf32>,
    %c0_54 = arith.constant 0 : index
    %c0_55 = arith.constant 0 : index
    %c0_56 = arith.constant 0 : index
    %c0_57 = arith.constant 0 : index
    %58 = vector.load %arg4[%c0_54, %c0_55, %c0_56, %c0_57] : memref<1x4x2x128xf32, #tpu.memory_space<vmem>>, vector<1x1x2x128xf32>
    %59 = vector.shape_cast %58 : vector<1x1x2x128xf32> to vector<2x128xf32>
    %c2_58 = arith.constant 2 : index
    %c0_59 = arith.constant 0 : index
    %60 = memref.load %arg2[%c2_58, %c0_59] : memref<3x4xf32, #tpu.memory_space<smem>>
    %61 = vector.broadcast %60 : f32 to vector<2x128xf32>
    %62 = arith.mulf %59, %61 : vector<2x128xf32>
    %c0_60 = arith.constant 0 : index
    %c1_61 = arith.constant 1 : index
    %c0_62 = arith.constant 0 : index
    %c0_63 = arith.constant 0 : index
    %63 = vector.load %arg4[%c0_60, %c1_61, %c0_62, %c0_63] : memref<1x4x2x128xf32, #tpu.memory_space<vmem>>, vector<1x1x2x128xf32>
    %64 = vector.shape_cast %63 : vector<1x1x2x128xf32> to vector<2x128xf32>
    %c2_64 = arith.constant 2 : index
    %c1_65 = arith.constant 1 : index
    %65 = memref.load %arg2[%c2_64, %c1_65] : memref<3x4xf32, #tpu.memory_space<smem>>
    %66 = vector.broadcast %65 : f32 to vector<2x128xf32>
    %67 = arith.mulf %64, %66 : vector<2x128xf32>
    %68 = arith.addf %62, %67 : vector<2x128xf32>
    %c0_66 = arith.constant 0 : index
    %c2_67 = arith.constant 2 : index
    %c0_68 = arith.constant 0 : index
    %c0_69 = arith.constant 0 : index
    %69 = vector.load %arg4[%c0_66, %c2_67, %c0_68, %c0_69] : memref<1x4x2x128xf32, #tpu.memory_space<vmem>>, vector<1x1x2x128xf32>
    %70 = vector.shape_cast %69 : vector<1x1x2x128xf32> to vector<2x128xf32>
    %c2_70 = arith.constant 2 : index
    %c2_71 = arith.constant 2 : index
    %71 = memref.load %arg2[%c2_70, %c2_71] : memref<3x4xf32, #tpu.memory_space<smem>>
    %72 = vector.broadcast %71 : f32 to vector<2x128xf32>
    %73 = arith.mulf %70, %72 : vector<2x128xf32>
    %74 = arith.addf %68, %73 : vector<2x128xf32>
    %c0_72 = arith.constant 0 : index
    %c3_73 = arith.constant 3 : index
    %c0_74 = arith.constant 0 : index
    %c0_75 = arith.constant 0 : index
    %75 = vector.load %arg4[%c0_72, %c3_73, %c0_74, %c0_75] : memref<1x4x2x128xf32, #tpu.memory_space<vmem>>, vector<1x1x2x128xf32>
    %76 = vector.shape_cast %75 : vector<1x1x2x128xf32> to vector<2x128xf32>
    %c2_76 = arith.constant 2 : index
    %c3_77 = arith.constant 3 : index
    %77 = memref.load %arg2[%c2_76, %c3_77] : memref<3x4xf32, #tpu.memory_space<smem>>
    %78 = vector.broadcast %77 : f32 to vector<2x128xf32>
    %79 = arith.mulf %76, %78 : vector<2x128xf32>
    %80 = arith.addf %74, %79 : vector<2x128xf32>
    %c2_78 = arith.constant 2 : index
    %81 = memref.load %arg3[%c2_78] : memref<3xf32, #tpu.memory_space<smem>>
    %82 = vector.broadcast %81 : f32 to vector<2x128xf32>
    %83 = arith.addf %80, %82 : vector<2x128xf32>
    %c0_79 = arith.constant 0 : index
    %c2_80 = arith.constant 2 : index
    %c0_81 = arith.constant 0 : index
    %c0_82 = arith.constant 0 : index
    %84 = vector.load %arg5[%c0_79, %c2_80, %c0_81, %c0_82] : memref<1x3x2x128xf32, #tpu.memory_space<vmem>>, vector<1x1x2x128xf32>
    %85 = vector.shape_cast %84 : vector<1x1x2x128xf32> to vector<2x128xf32>
    %86 = vector.shape_cast %83 : vector<2x128xf32> to vector<1x1x2x128xf32>
    tpu.vector_store %arg5[%c0_79, %c2_80, %c0_81, %c0_82], %86 {strides = array<i32>} : memref<1x3x2x128xf32, #tpu.memory_space<vmem>>, vector<1x1x2x128xf32>,
    return
  }
  func.func @transform_0(%arg0: i32, %arg1: i32) -> (i32, i32) {
    %c0_i32 = arith.constant 0 : i32
    %c0_i32_0 = arith.constant 0 : i32
    %c0_i32_1 = arith.constant 0 : i32
    return %c0_i32, %c0_i32_0 : i32, i32
  }
  func.func @transform_1(%arg0: i32, %arg1: i32) -> i32 {
    %c0_i32 = arith.constant 0 : i32
    %c0_i32_0 = arith.constant 0 : i32
    return %c0_i32 : i32
  }
  func.func @transform_2(%arg0: i32, %arg1: i32) -> (i32, i32, i32, i32) {
    %c0_i32 = arith.constant 0 : i32
    %c0_i32_0 = arith.constant 0 : i32
    %c0_i32_1 = arith.constant 0 : i32
    return %arg0, %c0_i32, %arg1, %c0_i32_0 : i32, i32, i32, i32
  }
  func.func @transform_3(%arg0: i32, %arg1: i32) -> (i32, i32, i32, i32) {
    %c0_i32 = arith.constant 0 : i32
    %c0_i32_0 = arith.constant 0 : i32
    %c0_i32_1 = arith.constant 0 : i32
    return %arg0, %c0_i32, %arg1, %c0_i32_0 : i32, i32, i32, i32
  }
}

</mosaic_0001>

<bundles_post_ra>
// kernel: outconv.1
= control target key start
LH: loop header
LB: loop body
LE: loop exit
PB: predicated region body
PF: predicated region fallthrough
CT: control target
= control target key end

     0   :  { %8 = vsyncpa [#allocation3], 0  ;;  %s662_s0 = inlined_call_operand.vmem [shape: f32[3,4], index: 0, kind: input, shape index: {}]   ;;  %s663_s1 = inlined_call_operand.vmem [shape: f32[3], index: 1, kind: input, shape index: {}]   ;;  %s664_s2 = inlined_call_operand.vmem [shape: f32[2,4,2,128], index: 2, kind: input, shape index: {}]   ;;  %s665_s3 = inlined_call_operand.vmem [shape: f32[2,3,2,128], index: 3, kind: output, shape index: {}]  }
   0x1   :  { %9 = vsyncpa [#allocation5], 0  ;;  %s578_s12 = smov 0   ;;  %s580_s13 = smov 0  }
   0x2   :  { %s582_s14 = smov 0  }
   0x3 LB: > { %s409_s15 = sadd.s32 4294967295, %s554_s14   ;;  %s27_s16 = sadd.s32 1, %s550_s13  ;;  %s554_s14 = sphi %s582_s14, %s15_s14   ;;  %s550_s13 = sphi %s580_s13, %s668_s13   ;;  %s546_s12 = sphi %s578_s12, %s667_s12  }
   0x4   : > { %p29_p0 = scmp.ge.s32.totalorder %s27_s16, 2  ;;  %p411_p1 = scmp.ge.s32.totalorder %s554_s14, 1 }
   0x5   : > { %p130_p2 = scmp.lt.s32.totalorder %s554_s14, 3  ;;  %p599_p4 = scmp.eq.s32.totalorder %s409_s15, 0 }
   0x6   : > { %s670_s16 = smov (%p29_p0, %s27_s16), 0  ;;  %s142_s20 = sshll.u32 %s662_s0, 4  ;;  %s143_s20 = int_to_ptr.vmem [resolvable:$true] %s142_s20 }
   0x7   : > { %p131_p3 = pnand %p411_p1, %p130_p2  ;;  %s152_s23 = sshll.u32 %s663_s1, 4  ;;  %s153_s23 = int_to_ptr.vmem [resolvable:$true] %s152_s23 }
   0x8   : > { %s556_s24 = smov [#allocation2]   ;;  %s557_s25 = smov [#allocation4]  }
   0x9   : > { %p457_p5 = pneg %p131_p3 }
   0xa   : > { %176 = sbr.rel (%p131_p3) target bundleno = 50 (0x32), region = 32 }
   0xb   : > { %p458_p6 = pnand %p599_p4, %p457_p5 }
   0xd   : > { %460 = dma.vmem_to_smem (!%p458_p6), %s143_s20, 64, %s556_s24, [#allocation3]  }
   0xe   : > { %463 = dma.vmem_to_smem (!%p458_p6), %s153_s23, 16, %s557_s25, [#allocation5]  }
   0xf   : > { %537 = dma.done.wait (%p599_p4), [#allocation3], 64  }
  0x10   : > { %539 = vsyncadd (%p599_p4), [#allocation3], 4294967232 }
  0x11   : > { %541 = dma.done.wait (%p599_p4), [#allocation5], 16  }
  0x12   : > { %543 = vsyncadd (%p599_p4), [#allocation5], 4294967280 }
  0x13   : > { %188 = sfence }
  0x14   : > { %p213_p7 = scmp.lt.s32.totalorder %s546_s12, 1  ;;  %s230_s26 = sld [smem:[#allocation2]] }
  0x15   : > { %s422_s27 = sld [smem:[#allocation2 + $0x1]] }
  0x16   : > { %s672_s12 = smov (!%p213_p7, %s546_s12), 1  ;;  %s424_s28 = sld [smem:[#allocation2 + $0x2]] }
  0x17   : > { %s447_s29 = sshll.u32 %s672_s12, 3  ;;  %s426_s6 = sld [smem:[#allocation2 + $0x3]] }
  0x18   : > { %s627_s5 = scalar_lea.vmem %s664_s2, %s447_s29  ;;  %s251_s7 = sld [smem:[#allocation4]] }
  0x19   : > { %v229_v0 = vld [vmem:[%s627_s5] sm:$0x3]  ;;  %v421_v2 = vld [vmem:[%s627_s5 + $0x2] sm:$0x3]  ;;  %v423_v5 = vld [vmem:[%s627_s5 + $0x4] sm:$0x3] }
  0x1a   : > { %v231_v1 = vstv %s230_s26  ;;  %s427_s8 = sld [smem:[#allocation2 + $0x80]]  ;;  %v425_v8 = vld [vmem:[%s627_s5 + $0x6] sm:$0x3]  ;;  %s448_s11 = smul.u32 6, %s672_s12  ;;  %v255_v14 = vld [vmem:[%s627_s5] sm:$0x3] }
  0x1b   : > { %v232_v3 = vmul.f32 %v231_v1, %v229_v0  ;;  %v236_v4 = vstv %s422_s27  ;;  %s429_s9 = sld [smem:[#allocation2 + $0x81]]  ;;  %v428_v16 = vld [vmem:[%s627_s5 + $0x2] sm:$0x3]  ;;  %v430_v19 = vld [vmem:[%s627_s5 + $0x4] sm:$0x3] }
  0x1c   : > { %v237_v6 = vmul.f32 %v421_v2, %v236_v4  ;;  %v242_v7 = vstv %s424_s28  ;;  %s431_s10 = sld [smem:[#allocation2 + $0x82]]  ;;  %s642_s12 = scalar_lea.vmem %s665_s3, %s448_s11  ;;  %v432_v22 = vld [vmem:[%s627_s5 + $0x6] sm:$0x3]  ;;  %v279_v28 = vld [vmem:[%s627_s5] sm:$0x3] }
  0x1d   : > { %v243_v10 = vmul.f32 %v423_v5, %v242_v7  ;;  %v248_v11 = vstv %s426_s6  ;;  %s433_s15 = sld [smem:[#allocation2 + $0x83]]  ;;  %v437_v31 = vld [vmem:[%s627_s5 + $0x2] sm:$0x3]  ;;  %v439_v33 = vld [vmem:[%s627_s5 + $0x4] sm:$0x3] }
  0x1e   : > { %v238_v9 = vadd.f32 %v237_v6, %v232_v3  ;;  %v249_v13 = vmul.f32 %v425_v8, %v248_v11  ;;  %s635_s17 = sld [smem:[#allocation4 + $0x1]]  ;;  %v252_v15 = vstv %s251_s7  ;;  %v441_v37 = vld [vmem:[%s627_s5 + $0x6] sm:$0x3] }
  0x1f   : > { %s436_s18 = sld [smem:[#allocation2 + $0x100]] }
  0x20   : > { %v244_v12 = vadd.f32 %v243_v10, %v238_v9  ;;  %v257_v18 = vstv %s427_s8  ;;  %s438_s19 = sld [smem:[#allocation2 + $0x101]] }
  0x21   : > { %v258_v20 = vmul.f32 %v257_v18, %v255_v14  ;;  %v261_v21 = vstv %s429_s9  ;;  %s440_s22 = sld [smem:[#allocation2 + $0x102]] }
  0x22   : > { %v250_v17 = vadd.f32 %v249_v13, %v244_v12  ;;  %v262_v24 = vmul.f32 %v428_v16, %v261_v21  ;;  %v266_v25 = vstv %s431_s10  ;;  %s442_s23 = sld [smem:[#allocation2 + $0x103]] }
  0x23   : > { %v267_v26 = vmul.f32 %v430_v19, %v266_v25  ;;  %v271_v27 = vstv %s433_s15  ;;  %s443_s24 = sld [smem:[#allocation4 + $0x2]] }
  0x24   : > { %v253_v23 = vadd.f32 %v252_v15, %v250_v17  ;;  %v263_v29 = vadd.f32 %v262_v24, %v258_v20  ;;  %v272_v30 = vmul.f32 %v432_v22, %v271_v27  ;;  %v275_v38 = vstv %s635_s17 }
  0x25   : > { %v281_v32 = vstv %s436_s18 }
  0x26   : > { %254 = vst [vmem:[%s642_s12] sm:$0x3] %v253_v23  ;;  %v268_v34 = vadd.f32 %v267_v26, %v263_v29  ;;  %v282_v35 = vmul.f32 %v281_v32, %v279_v28  ;;  %v285_v36 = vstv %s438_s19 }
  0x27   : > { %v286_v39 = vmul.f32 %v437_v31, %v285_v36  ;;  %v290_v40 = vstv %s440_s22 }
  0x28   : > { %v273_v41 = vadd.f32 %v272_v30, %v268_v34  ;;  %v291_v42 = vmul.f32 %v439_v33, %v290_v40  ;;  %v295_v43 = vstv %s442_s23 }
  0x29   : > { %v287_v44 = vadd.f32 %v286_v39, %v282_v35  ;;  %v296_v45 = vmul.f32 %v441_v37, %v295_v43  ;;  %v299_v48 = vstv %s443_s24 }
  0x2a   : > { %v276_v46 = vadd.f32 %v275_v38, %v273_v41 }
  0x2b   : > { %v292_v47 = vadd.f32 %v291_v42, %v287_v44 }
  0x2c   : > { %435 = vst [vmem:[%s642_s12 + $0x2] sm:$0x3] %v276_v46 }
  0x2d   : > { %v297_v49 = vadd.f32 %v296_v45, %v292_v47 }
  0x2f   : > { %v300_v50 = vadd.f32 %v299_v48, %v297_v49 }
  0x31   : > { %444 = vst [vmem:[%s642_s12 + $0x4] sm:$0x3] %v300_v50 }
  0x32 PF: > { %s15_s14 = sadd.s32 1, %s554_s14   ;;  %s667_s12 = smov %s550_s13 }
  0x33   : > { %p12_p8 = scmp.ge.s32.totalorder %s15_s14, 4   ;;  %s668_s13 = smov %s670_s16 }
  0x35   :  { %14 = sbr.rel (!%p12_p8) target bundleno = 3 (0x3), region = 76 }
  0x3a   :  { %330 = vsyncpa [#allocation3], 1 }
  0x3b   :  { %332 = vsyncpa [#allocation3 + $0x1], 1 }
  0x3c   :  { %333 = vsyncpa [#allocation5], 1 }

</bundles_post_ra>
